<compile_context>
chip_gen: v5e
topology: v5e:2x2
jax: 0.10.0
libtpu: 0.0.40
codegen_flags: <defaults>
</compile_context>

<pallas_src>
import functools

import jax
import jax.numpy as jnp
from jax.experimental import pallas as pl
from jax.experimental.pallas import tpu as pltpu

BN_EPS = 1e-5
LANE = 128
# Per-core VMEM budget used for tile sizing: leaves headroom on v7x (64 MiB/TC)
# and is comfortably inside v5e/v6e's 128 MiB.
VMEM_BUDGET = 48 * 1024 * 1024


def mlp_kernel(x_ref, w_ref, gamma_ref, beta_ref, o_ref):
    # Linear (bias folded away by training-mode BN): bf16 MXU, f32 accumulate.
    z = jnp.dot(x_ref[...], w_ref[...], preferred_element_type=jnp.float32)

    # Batch statistics for this fout column block. Centered two-pass variance:
    # z is resident so the second pass is cheap, and it avoids the
    # E[z^2] - E[z]^2 cancellation issue. Biased variance, matching PyTorch
    # BatchNorm1d in training mode.
    inv_n = 1.0 / z.shape[0]
    mean = jnp.sum(z, axis=0, keepdims=True) * inv_n        # (1, TN)
    zc = z - mean
    var = jnp.sum(zc * zc, axis=0, keepdims=True) * inv_n   # (1, TN)

    # Fused BN affine + ReLU; rsqrt runs on the EUP slot (free vs. VALU).
    scale = gamma_ref[...] * jax.lax.rsqrt(var + BN_EPS)
    o_ref[...] = jnp.maximum(zc * scale + beta_ref[...], 0.0).astype(o_ref.dtype)


def _vmem_estimate(n, fin, tn, x_isz, w_isz, o_isz):
    """Approximate VMEM footprint of one grid step (double-buffered specs)."""
    return (2 * n * fin * x_isz      # resident x (budget for 2 buffers)
            + 2 * fin * tn * w_isz   # W^T column block, double-buffered
            + 2 * n * tn * o_isz     # output tile, double-buffered
            + n * tn * 4             # f32 z / epilogue intermediate
            + 2 * 2 * tn * 4)        # gamma / beta blocks


def _pick_tn(n, fin, fout_pad, x_isz, w_isz, o_isz, budget=VMEM_BUDGET):
    """Largest lane-dense column tile that divides fout_pad and fits VMEM,
    preferring >=2 tiles so the 'parallel' fout axis can use both v7x cores."""
    cands = [d for d in (512, 384, 256, 128) if fout_pad % d == 0]
    fits = [t for t in cands
            if _vmem_estimate(n, fin, t, x_isz, w_isz, o_isz) <= budget]
    if not fits:
        return cands[-1]  # 128 always divides fout_pad
    multi = [t for t in fits if fout_pad // t >= 2]
    return multi[0] if multi else fits[0]


def prepare_mlp_params(w, b, gamma, beta, *, compute_dtype=jnp.bfloat16):
    """One-time (init-time) parameter prep: transpose + 128-pad W and cast it to
    the MXU compute dtype, pad gamma/beta. Keeps all weight reshuffling out of
    the per-call path.

    `b` (the Linear bias) is accepted for API parity but dropped: training-mode
    BatchNorm subtracts the per-feature batch mean, so the bias cancels exactly.
    """
    del b  # TODO(synk): reintroduce bias if running-stat updates / eval-mode BN are added.
    fout, fin = w.shape
    fout_pad = ((fout + LANE - 1) // LANE) * LANE
    wt = jnp.zeros((fin, fout_pad), compute_dtype).at[:, :fout].set(
        w.T.astype(compute_dtype))
    g2 = jnp.zeros((1, fout_pad), jnp.float32).at[:, :fout].set(
        gamma.astype(jnp.float32))
    bt2 = jnp.zeros((1, fout_pad), jnp.float32).at[:, :fout].set(
        beta.astype(jnp.float32))
    return wt, g2, bt2


@functools.partial(jax.jit, static_argnames=("fout",))
def mlp_forward(x, wt, g2, bt2, *, fout):
    """x: (N, fin) f32; wt: (fin, fout_pad) bf16 (pre-transposed/padded);
    g2/bt2: (1, fout_pad) f32. Returns (N, fout) in x.dtype."""
    n, fin = x.shape
    fin_w, fout_pad = wt.shape
    assert fin == fin_w, "x / prepared-weight fin mismatch"

    x_c = x.astype(wt.dtype)  # bf16 MXU operand; accumulation stays f32 in-kernel
    out_dtype = x.dtype

    x_isz = x_c.dtype.itemsize
    w_isz = wt.dtype.itemsize
    o_isz = jnp.dtype(out_dtype).itemsize

    tn = _pick_tn(n, fin, fout_pad, x_isz, w_isz, o_isz)
    est = _vmem_estimate(n, fin, tn, x_isz, w_isz, o_isz)
    vmem_limit = int(min(max(est * 1.25 + (4 << 20), 16 << 20), 64 << 20))

    grid = (fout_pad // tn,)
    out = pl.pallas_call(
        mlp_kernel,
        out_shape=jax.ShapeDtypeStruct((n, fout_pad), out_dtype),
        grid_spec=pltpu.PrefetchScalarGridSpec(
            num_scalar_prefetch=0,
            grid=grid,
            in_specs=[
                pl.BlockSpec((n, fin), lambda j: (0, 0)),    # x: resident across fout tiles
                pl.BlockSpec((fin, tn), lambda j: (0, j)),   # W^T column block (bf16)
                pl.BlockSpec((1, tn), lambda j: (0, j)),     # gamma block
                pl.BlockSpec((1, tn), lambda j: (0, j)),     # beta block
            ],
            out_specs=pl.BlockSpec((n, tn), lambda j: (0, j)),  # lane-dense, unmasked stores
        ),
        compiler_params=pltpu.CompilerParams(
            dimension_semantics=("parallel",),   # independent fout tiles (v7x: 2 TCs)
            vmem_limit_bytes=vmem_limit,
        ),
    )(x_c, wt, g2, bt2)

    # TODO(synk): for very large N on v7x (64 MiB VMEM), add an N-tiled
    # two-phase BN (accumulate per-fout-tile sum/sum-sq across N tiles in VMEM
    # scratch, then a second pass applying scale/shift+ReLU) instead of keeping
    # the full (N, fin) activation resident.
    return out if fout == fout_pad else out[:, :fout]


if __name__ == "__main__":
    # Small shapes consistent with the module: batch=16, fin=32, fout=64.
    N, FIN, FOUT = 16, 32, 64

    key = jax.random.PRNGKey(0)
    kx, kw, kb = jax.random.split(key, 3)

    x = jax.random.normal(kx, (N, FIN), dtype=jnp.float32)
    # Deterministic synthetic parameters (nn.Linear shapes / init ranges).
    bound = 1.0 / (FIN ** 0.5)
    w = jax.random.uniform(kw, (FOUT, FIN), minval=-bound, maxval=bound,
                           dtype=jnp.float32)
    b = jax.random.uniform(kb, (FOUT,), minval=-bound, maxval=bound,
                           dtype=jnp.float32)
    # BatchNorm1d affine params at their PyTorch init values.
    gamma = jnp.ones((FOUT,), dtype=jnp.float32)
    beta = jnp.zeros((FOUT,), dtype=jnp.float32)

    # One-time parameter prep (transpose/pad/cast), then the fused forward.
    wt, g2, bt2 = prepare_mlp_params(w, b, gamma, beta)
    out = mlp_forward(x, wt, g2, bt2, fout=FOUT)
    jax.block_until_ready(out)

    # Reference 1: numerics-matched (bf16 matmul operands, f32 everything else).
    z_bf = jnp.dot(x.astype(jnp.bfloat16), w.T.astype(jnp.bfloat16),
                   preferred_element_type=jnp.float32) + b
    m_bf = z_bf.mean(axis=0, keepdims=True)
    v_bf = ((z_bf - m_bf) ** 2).mean(axis=0, keepdims=True)
    ref_bf = jnp.maximum(
        gamma * (z_bf - m_bf) * jax.lax.rsqrt(v_bf + BN_EPS) + beta, 0.0)

    # Reference 2: full-f32 PyTorch semantics (loose tolerance: bf16 MXU inputs).
    z32 = x @ w.T + b
    m32 = z32.mean(axis=0, keepdims=True)
    v32 = ((z32 - m32) ** 2).mean(axis=0, keepdims=True)
    ref32 = jnp.maximum(gamma * (z32 - m32) / jnp.sqrt(v32 + BN_EPS) + beta, 0.0)

    assert out.shape == (N, FOUT), f"bad output shape {out.shape}"
    assert jnp.allclose(out, ref_bf, atol=2e-3, rtol=2e-3), "mismatch vs bf16-matched reference"
    assert jnp.allclose(out, ref32, atol=6e-2, rtol=6e-2), "mismatch vs f32 reference"

    print("KERNEL_OK")
</pallas_src>

<mosaic_0001>
module attributes {stable_mosaic.version = 11 : i64} {
  func.func @mlp_kernel(%arg0: i32, %arg1: memref<16x32xbf16, #tpu.memory_space<vmem>>, %arg2: memref<32x128xbf16, #tpu.memory_space<vmem>>, %arg3: memref<1x128xf32, #tpu.memory_space<vmem>>, %arg4: memref<1x128xf32, #tpu.memory_space<vmem>>, %arg5: memref<16x128xf32, #tpu.memory_space<vmem>>) attributes {dimension_semantics = [#tpu.dimension_semantics<parallel>], iteration_bounds = array<i64: 1>, scalar_prefetch = 0 : i64, scratch_operands = 0 : i64, tpu.core_type = #tpu.core_type<tc>, window_params = [{pipeline_mode = #tpu.pipeline_mode<synchronous>, transform_indices = @transform_0, window_bounds = array<i64: 16, 32>}, {transform_indices = @transform_1, window_bounds = array<i64: 32, 128>}, {transform_indices = @transform_2, window_bounds = array<i64: 1, 128>}, {transform_indices = @transform_3, window_bounds = array<i64: 1, 128>}, {transform_indices = @transform_4, window_bounds = array<i64: 16, 128>}]} {
    %c0 = arith.constant 0 : index
    %c0_0 = arith.constant 0 : index
    %0 = vector.load %arg1[%c0, %c0_0] : memref<16x32xbf16, #tpu.memory_space<vmem>>, vector<16x32xbf16>
    %c0_1 = arith.constant 0 : index
    %c0_2 = arith.constant 0 : index
    %1 = vector.load %arg2[%c0_1, %c0_2] : memref<32x128xbf16, #tpu.memory_space<vmem>>, vector<32x128xbf16>
    %cst = arith.constant dense<0.000000e+00> : vector<16x128xf32>
    %2 = tpu.matmul %0, %1, %cst {dimension_numbers = #tpu.dot_dimension_numbers<[1], [0], [0], [1], [0, 0, 1, 1], [], []>} : vector<16x32xbf16>, vector<32x128xbf16>, vector<16x128xf32> -> vector<16x128xf32>
    %cst_3 = arith.constant dense<0.000000e+00> : vector<128xf32>
    %3 = vector.multi_reduction <add>, %2, %cst_3 [0] : vector<16x128xf32> to vector<128xf32>
    %4 = vector.shape_cast %3 : vector<128xf32> to vector<1x128xf32>
    %cst_4 = arith.constant 6.250000e-02 : f32
    %5 = vector.broadcast %cst_4 : f32 to vector<1x128xf32>
    %6 = arith.mulf %4, %5 : vector<1x128xf32>
    %7 = vector.broadcast %6 : vector<1x128xf32> to vector<16x128xf32>
    %8 = arith.subf %2, %7 : vector<16x128xf32>
    %9 = arith.mulf %8, %8 : vector<16x128xf32>
    %cst_5 = arith.constant dense<0.000000e+00> : vector<128xf32>
    %10 = vector.multi_reduction <add>, %9, %cst_5 [0] : vector<16x128xf32> to vector<128xf32>
    %11 = vector.shape_cast %10 : vector<128xf32> to vector<1x128xf32>
    %cst_6 = arith.constant 6.250000e-02 : f32
    %12 = vector.broadcast %cst_6 : f32 to vector<1x128xf32>
    %13 = arith.mulf %11, %12 : vector<1x128xf32>
    %c0_7 = arith.constant 0 : index
    %c0_8 = arith.constant 0 : index
    %14 = vector.load %arg3[%c0_7, %c0_8] : memref<1x128xf32, #tpu.memory_space<vmem>>, vector<1x128xf32>
    %cst_9 = arith.constant 9.99999974E-6 : f32
    %15 = vector.broadcast %cst_9 : f32 to vector<1x128xf32>
    %16 = arith.addf %13, %15 : vector<1x128xf32>
    %17 = math.rsqrt %16 : vector<1x128xf32>
    %18 = arith.mulf %14, %17 : vector<1x128xf32>
    %19 = vector.broadcast %18 : vector<1x128xf32> to vector<16x128xf32>
    %20 = arith.mulf %8, %19 : vector<16x128xf32>
    %c0_10 = arith.constant 0 : index
    %c0_11 = arith.constant 0 : index
    %21 = vector.load %arg4[%c0_10, %c0_11] : memref<1x128xf32, #tpu.memory_space<vmem>>, vector<1x128xf32>
    %22 = vector.broadcast %21 : vector<1x128xf32> to vector<16x128xf32>
    %23 = arith.addf %20, %22 : vector<16x128xf32>
    %cst_12 = arith.constant 0.000000e+00 : f32
    %24 = vector.broadcast %cst_12 : f32 to vector<16x128xf32>
    %25 = arith.maximumf %23, %24 : vector<16x128xf32>
    %c0_13 = arith.constant 0 : index
    %c0_14 = arith.constant 0 : index
    %26 = vector.load %arg5[%c0_13, %c0_14] : memref<16x128xf32, #tpu.memory_space<vmem>>, vector<16x128xf32>
    tpu.vector_store %arg5[%c0_13, %c0_14], %25 {strides = array<i32>} : memref<16x128xf32, #tpu.memory_space<vmem>>, vector<16x128xf32>,
    return
  }
  func.func @transform_0(%arg0: i32) -> (i32, i32) {
    %c0_i32 = arith.constant 0 : i32
    %c0_i32_0 = arith.constant 0 : i32
    %c0_i32_1 = arith.constant 0 : i32
    return %c0_i32, %c0_i32_0 : i32, i32
  }
  func.func @transform_1(%arg0: i32) -> (i32, i32) {
    %c0_i32 = arith.constant 0 : i32
    %c0_i32_0 = arith.constant 0 : i32
    return %c0_i32, %arg0 : i32, i32
  }
  func.func @transform_2(%arg0: i32) -> (i32, i32) {
    %c0_i32 = arith.constant 0 : i32
    %c0_i32_0 = arith.constant 0 : i32
    return %c0_i32, %arg0 : i32, i32
  }
  func.func @transform_3(%arg0: i32) -> (i32, i32) {
    %c0_i32 = arith.constant 0 : i32
    %c0_i32_0 = arith.constant 0 : i32
    return %c0_i32, %arg0 : i32, i32
  }
  func.func @transform_4(%arg0: i32) -> (i32, i32) {
    %c0_i32 = arith.constant 0 : i32
    %c0_i32_0 = arith.constant 0 : i32
    return %c0_i32, %arg0 : i32, i32
  }
}

</mosaic_0001>

<bundles_post_ra>
// kernel: mlp_forward.1
= control target key start
LH: loop header
LB: loop body
LE: loop exit
PB: predicated region body
PF: predicated region fallthrough
CT: control target
= control target key end

     0   :  { %s220_s0 = inlined_call_operand.vmem [shape: bf16[16,32], index: 0, kind: input, shape index: {}]   ;;  %s221_s1 = inlined_call_operand.vmem [shape: bf16[32,128], index: 1, kind: input, shape index: {}]   ;;  %s222_s2 = inlined_call_operand.vmem [shape: f32[1,128], index: 2, kind: input, shape index: {}]   ;;  %s223_s3 = inlined_call_operand.vmem [shape: f32[1,128], index: 3, kind: input, shape index: {}]   ;;  %s224_s4 = inlined_call_operand.hbm [shape: f32[16,128], index: 4, kind: output, shape index: {}]  }
   0x1   :  { %v141_v0 = vld [vmem:[%s221_s1 + $0x8] sm:$0xff] }
   0x2   :  { %9 = vsyncpa [#allocation3], 0  ;;  %52 = vmatpush.bf16.msra.mxu0 %v141_v0  ;;  %v140_v1 = vld [vmem:[%s221_s1] sm:$0xff]  ;;  %vm42_vm0 = vcmask 261120   ;;  %s174_s23 = smov [#allocation2]   ;;  %s114_s27 = sshll.u32 %s224_s4, 4  ;;  %s115_s27 = int_to_ptr.hbm [resolvable:$true] %s114_s27 }
   0x3   :  { %v139_v2 = vld [vmem:[%s220_s0] sm:$0xff]  ;;  %s112_s24 = sshll.u32 %s174_s23, 4  ;;  %s176_s28 = smov 8   ;;  %s113_s24 = int_to_ptr.vmem [resolvable:$true] %s112_s24 }
   0x4   :  { %v80_v31 = vld [vmem:[%s222_s2] sm:$0x1]  ;;  %s175_s2 = smov 128  }
   0x5   :  { %v145_v36 = vld [vmem:[%s223_s3] ss:$0 sm:$0xff] }
   0x6   :  { %53 = vmatpush.bf16.msra.mxu0 %v140_v1 }
   0x9   :  { %138 = vmatmul.msk.bf16.vlgmr.msra.gmra.mxu0 %vm42_vm0, %v139_v2 }
  0x86   :  { %v55_v3 = vpop.f32.mrf.mxu0 }
  0x8e   :  { %v57_v4 = vpop.f32.mrf.mxu0 }
  0x8f   :  { %v60_v5 = vadd.f32 %v57_v4, %v55_v3 }
  0x91   :  { %v61_v6 = vrot.slane %v60_v5, 4 }
  0x93   :  { %v62_v7 = vadd.f32 %v61_v6, %v60_v5 }
  0x95   :  { %v63_v8 = vrot.slane %v62_v7, 2 }
  0x97   :  { %v64_v9 = vadd.f32 %v63_v8, %v62_v7 }
  0x99   :  { %v65_v10 = vrot.slane %v64_v9, 1 }
  0x9b   :  { %v66_v11 = vadd.f32 %v65_v10, %v64_v9 }
  0x9d   :  { %v67_v12 = vmul.f32 0.0625, %v66_v11 }
  0x9f   :  { %v68_v13 = vsub.f32 %v55_v3, %v67_v12  ;;  %v69_v14 = vsub.f32 %v57_v4, %v67_v12 }
  0xa1   :  { %v70_v15 = vmul.f32 %v68_v13, %v68_v13  ;;  %v71_v16 = vmul.f32 %v69_v14, %v69_v14 }
  0xa3   :  { %v72_v17 = vadd.f32 %v71_v16, %v70_v15 }
  0xa5   :  { %v73_v18 = vrot.slane %v72_v17, 4 }
  0xa7   :  { %v74_v19 = vadd.f32 %v73_v18, %v72_v17 }
  0xa9   :  { %v75_v20 = vrot.slane %v74_v19, 2 }
  0xab   :  { %v76_v21 = vadd.f32 %v75_v20, %v74_v19 }
  0xad   :  { %v77_v22 = vrot.slane %v76_v21, 1 }
  0xaf   :  { %v78_v23 = vadd.f32 %v77_v22, %v76_v21 }
  0xb1   :  { %v79_v24 = vmul.f32 0.0625, %v78_v23 }
  0xb3   :  { %v81_v25 = vadd.f32 1e-05, %v79_v24 }
  0xb5   :  { %146 = vrsqrt.f32 %v81_v25  ;;  %vm88_vm2 = vweird.f32 %v81_v25 }
  0xbb   :  { %v147_v26 = vpop.eup %146 }
  0xbc   :  { %v83_v27 = vmul.f32 %v147_v26, %v81_v25  ;;  %vm89_vm1 = vweird.f32 %v147_v26 }
  0xbd   :  { %vm90_vm3 = vmor %vm88_vm2, %vm89_vm1 }
  0xbe   :  { %v84_v28 = vmul.f32 %v147_v26, %v83_v27 }
  0xc0   :  { %v85_v29 = vmul.f32 0.5, %v84_v28 }
  0xc2   :  { %v86_v30 = vsub.f32 1.5, %v85_v29 }
  0xc4   :  { %v87_v32 = vmul.f32 %v147_v26, %v86_v30 }
  0xc6   :  { %v91_v33 = vsel %vm90_vm3, %v147_v26, %v87_v32 }
  0xc7   :  { %v92_v34 = vmul.f32 %v91_v33, %v80_v31 }
  0xc9   :  { %v94_v35 = vperm.slane %v92_v34, 0 }
  0xcb   :  { %v96_v37 = vmul.f32 %v94_v35, %v68_v13  ;;  %v97_v38 = vmul.f32 %v94_v35, %v69_v14 }
  0xcd   :  { %v102_v39 = vadd.f32 %v145_v36, %v96_v37  ;;  %v103_v40 = vadd.f32 %v145_v36, %v97_v38 }
  0xcf   :  { %v104_v41 = vmax.f32 %v102_v39, 0.0  ;;  %v105_v42 = vmax.f32 %v103_v40, 0.0 }
  0xd1   :  { %106 = vst [vmem:[#allocation2] sm:$0xff] %v104_v41 }
  0xd2   :  { %107 = vst [vmem:[#allocation2 + $0x8] sm:$0xff] %v105_v42 }
  0xd3   :  { %120 = dma.vmem_to_hbm [thread:$0]  %s113_s24, 256, %s115_s27, [#allocation3], %s175_s2, %s175_s2, %s176_s28  }
  0xd4   :  { %172 = dma.done.wait [#allocation3], 256  }
  0xd5   :  { %173 = vsyncadd [#allocation3], 4294967040 }
  0xd6   :  { %125 = vsyncpa [#allocation3], 1 }

</bundles_post_ra>
